<compile_context>
chip_gen: v7x
topology: tpu7x:2x2x1
jax: 0.10.0
libtpu: 0.0.40
codegen_flags: <defaults>
</compile_context>

<pallas_src>
import functools

import jax
import jax.numpy as jnp
from jax.experimental import pallas as pl
from jax.experimental.pallas import tpu as pltpu


def _cdiv(a, b):
    return (a + b - 1) // b


def _round_up(x, m):
    return _cdiv(x, m) * m


def _balanced_tile(dim, target, mult):
    """Largest tile <= target that splits `dim` into near-equal, mult-aligned pieces."""
    if dim <= target:
        return dim                      # single full-extent block (always layout-legal)
    n_tiles = _cdiv(dim, target)
    return _round_up(_cdiv(dim, n_tiles), mult)


# --------------------------------------------------------------------------- #
# Kernels
# --------------------------------------------------------------------------- #
def _shared_dot_small_kernel(*refs, has_bias, compute_dtype):
    # Collapsed path: grid = (B, N tiles). Whole (M, I) weight resident in VMEM.
    # refs: x (1, I, tN), w (M, I), [bias (M, 1) f32], out (1, M, tN)
    if has_bias:
        x_ref, w_ref, b_ref, o_ref = refs
    else:
        x_ref, w_ref, o_ref = refs
    x = x_ref[0]
    if x.dtype != compute_dtype:
        x = x.astype(compute_dtype)          # cast the VMEM block, not HBM
    acc = jnp.dot(w_ref[...], x, preferred_element_type=jnp.float32)
    if has_bias:
        acc = acc + b_ref[...]               # (M, 1) broadcasts over lanes (VPU)
    o_ref[0] = acc.astype(o_ref.dtype)


def _shared_dot_tiled_kernel(*refs, has_bias, compute_dtype, w_resident):
    # Tiled path: grid = (B, M tiles, N tiles, K tiles) with K last ("arbitrary").
    # refs: x (1, tK, tN), w (nK or 1, tM, tK), [bias (tM, 1) f32],
    #       out (1, tM, tN), acc (tM, tN) f32 scratch.
    if has_bias:
        x_ref, w_ref, b_ref, o_ref, acc_ref = refs
    else:
        x_ref, w_ref, o_ref, acc_ref = refs
    k = pl.program_id(3)

    @pl.when(k == 0)
    def _():
        if has_bias:
            # Fold the bias into the accumulator init (saves an epilogue pass).
            acc_ref[...] = jnp.zeros_like(acc_ref) + b_ref[...]
        else:
            acc_ref[...] = jnp.zeros_like(acc_ref)

    x = x_ref[0]
    if x.dtype != compute_dtype:
        x = x.astype(compute_dtype)
    w = w_ref[k] if w_resident else w_ref[0]
    acc_ref[...] += jnp.dot(w, x, preferred_element_type=jnp.float32)

    @pl.when(k == pl.num_programs(3) - 1)
    def _():
        o_ref[0] = acc_ref[...].astype(o_ref.dtype)


# --------------------------------------------------------------------------- #
# Wrapper
# --------------------------------------------------------------------------- #
def shared_dot(x, weight, bias=None, *, compute_dtype=jnp.bfloat16,
               tile_m=512, tile_n=1024, tile_k=512):
    """SharedDot forward.

    x: (B, I, N), weight: (C, O, I), bias: (C, O) or None.
    Returns (B, C, O, N), or (B, O, N) when C == 1 (matches torch squeeze_(1)).
    compute_dtype: dtype fed to the MXU (default bf16, f32 accumulation, output
    keeps x.dtype). Pass None to compute in the input dtype.
    """
    B, I, N = x.shape
    C, O, I2 = weight.shape
    assert I2 == I, "in_features mismatch"
    out_dtype = x.dtype
    M = C * O
    has_bias = bias is not None

    if compute_dtype is None:
        compute_dtype = jnp.result_type(x.dtype, weight.dtype)
    compute_dtype = jnp.dtype(compute_dtype)

    # Weight / bias are tiny: reshape & cast them wrapper-side (one-time).
    # x is deliberately untouched here (no pad / astype HBM pass).
    w2 = weight.reshape(M, I).astype(compute_dtype)
    b2 = bias.reshape(M, 1).astype(jnp.float32) if has_bias else None

    x_size = jnp.dtype(x.dtype).itemsize
    c_size = compute_dtype.itemsize
    o_size = jnp.dtype(out_dtype).itemsize

    # VMEM budget from the actual chip (v7x: 64 MiB, v5e/v6e: 128 MiB).
    try:
        vmem_cap = int(pltpu.get_tpu_info().vmem_capacity_bytes)
    except Exception:
        vmem_cap = 64 * 1024 * 1024
    vmem_budget = min(vmem_cap * 3 // 4, 100 * 1024 * 1024)
    slack = 2 * 1024 * 1024  # headroom for Mosaic internal scratch

    flops = int(2 * B * M * I * N)

    # ---------------- Collapsed path: grid (B, N tiles), weight resident. ----
    def fits_collapsed(tn):
        return (2 * M * I * c_size            # resident weight (x2 buffers, safe)
                + 2 * I * tn * x_size         # x double buffer
                + 2 * M * tn * o_size         # out double buffer
                + (2 * M * 4 if has_bias else 0)
                + slack) <= vmem_budget

    tN = _balanced_tile(N, tile_n, 128)
    # v7x has 2 TensorCores: make sure there are >= 2 parallel grid tiles.
    if B * _cdiv(N, tN) < 2 and N >= 256:
        tN = _round_up(_cdiv(N, 2), 128)
    while not fits_collapsed(tN) and tN > 128:
        tN = max(128, _round_up(tN // 2, 128))

    if fits_collapsed(tN):
        grid = (B, _cdiv(N, tN))
        x_spec = pl.BlockSpec((1, I, tN), lambda b, n: (b, 0, n))
        # Constant block index -> weight/bias stay resident in VMEM across steps.
        w_spec = pl.BlockSpec((M, I), lambda b, n: (0, 0))
        o_spec = pl.BlockSpec((1, M, tN), lambda b, n: (b, 0, n))
        in_specs = [x_spec, w_spec]
        operands = [x, w2]
        if has_bias:
            in_specs.append(pl.BlockSpec((M, 1), lambda b, n: (0, 0)))
            operands.append(b2)
        kernel = functools.partial(_shared_dot_small_kernel,
                                   has_bias=has_bias, compute_dtype=compute_dtype)
        cost = pl.CostEstimate(
            flops=flops, transcendentals=0,
            bytes_accessed=int(B * I * N * x_size + M * I * c_size
                               + B * M * N * o_size))
        out = pl.pallas_call(
            kernel,
            out_shape=jax.ShapeDtypeStruct((B, M, N), out_dtype),
            grid_spec=pltpu.PrefetchScalarGridSpec(
                num_scalar_prefetch=0, grid=grid,
                in_specs=in_specs, out_specs=o_spec),
            compiler_params=pltpu.CompilerParams(
                dimension_semantics=("parallel", "parallel"),
                vmem_limit_bytes=vmem_budget),
            cost_estimate=cost,
        )(*operands)
    else:
        # ---------------- Tiled fallback: large I and/or M. ------------------
        tM = _round_up(M, 128) if M <= 512 else _balanced_tile(M, tile_m, 128)
        tK = _balanced_tile(I, tile_k, 128)
        nM, nK = _cdiv(M, tM), _cdiv(I, tK)
        Mp, Kp = nM * tM, nK * tK

        # Keep the whole K extent of the current M tile resident when it fits.
        w_resident = 2 * nK * tM * tK * c_size <= vmem_budget // 2

        def vmem_tiled(tn):
            w_bufs = (2 * nK if w_resident else 2) * tM * tK * c_size
            return (w_bufs
                    + 2 * tK * tn * x_size        # x double buffer
                    + 2 * tM * tn * o_size        # out double buffer
                    + tM * tn * 4                 # f32 accumulator
                    + (2 * tM * 4 if has_bias else 0)
                    + slack)

        tN2 = _balanced_tile(N, tile_n, 128)
        while vmem_tiled(tN2) > vmem_budget and tN2 > 128:
            tN2 = max(128, _round_up(tN2 // 2, 128))
        # TODO(synk): if this still exceeds the budget (pathological tM * I), tM
        # would also need to shrink; not expected for SharedDot-style shapes.

        # Zero-pad ONLY the small weight (and bias): zero K-tail columns kill the
        # garbage rows Pallas reads in the K edge block of x, so x never needs
        # padding and the output never needs slicing.
        w2p = jnp.pad(w2, ((0, Mp - M), (0, Kp - I)))
        w3 = w2p.reshape(Mp, nK, tK).transpose(1, 0, 2)      # (nK, Mp, tK)

        grid = (B, nM, _cdiv(N, tN2), nK)
        x_spec = pl.BlockSpec((1, tK, tN2), lambda b, m, n, k: (b, k, n))
        if w_resident:
            w_spec = pl.BlockSpec((nK, tM, tK), lambda b, m, n, k: (0, m, 0))
        else:
            w_spec = pl.BlockSpec((1, tM, tK), lambda b, m, n, k: (k, m, 0))
        o_spec = pl.BlockSpec((1, tM, tN2), lambda b, m, n, k: (b, m, n))
        in_specs = [x_spec, w_spec]
        operands = [x, w3]
        if has_bias:
            b2p = jnp.pad(b2, ((0, Mp - M), (0, 0)))
            in_specs.append(pl.BlockSpec((tM, 1), lambda b, m, n, k: (m, 0)))
            operands.append(b2p)
        kernel = functools.partial(_shared_dot_tiled_kernel,
                                   has_bias=has_bias, compute_dtype=compute_dtype,
                                   w_resident=w_resident)
        cost = pl.CostEstimate(
            flops=flops, transcendentals=0,
            bytes_accessed=int(B * I * N * x_size * nM
                               + B * nM * tM * Kp * c_size
                               + B * M * N * o_size))
        out = pl.pallas_call(
            kernel,
            out_shape=jax.ShapeDtypeStruct((B, M, N), out_dtype),
            grid_spec=pltpu.PrefetchScalarGridSpec(
                num_scalar_prefetch=0, grid=grid,
                in_specs=in_specs, out_specs=o_spec,
                scratch_shapes=[pltpu.VMEM((tM, tN2), jnp.float32)]),
            compiler_params=pltpu.CompilerParams(
                dimension_semantics=("parallel", "parallel", "parallel", "arbitrary"),
                vmem_limit_bytes=vmem_budget),
            cost_estimate=cost,
        )(*operands)

    out = out.reshape(B, C, O, N)
    if C == 1:
        out = out[:, 0]               # matches torch output.squeeze_(1)
    return out


if __name__ == "__main__":
    # Small shapes consistent with the module: batch=2, channels=4,
    # out_features=16, in_features=32, trailing spatial/seq dim N=256.
    B, I, O, C, N = 2, 32, 16, 4, 256

    key = jax.random.PRNGKey(0)
    kx, kw, kb = jax.random.split(key, 3)

    # kaiming_uniform_-like init (a=0): fan_in = O * I for a (C, O, I) tensor.
    bound = (6.0 / (O * I)) ** 0.5
    weight = jax.random.uniform(kw, (C, O, I), jnp.float32, -bound, bound)
    bias = 0.01 * jax.random.normal(kb, (C, O), jnp.float32)
    x = jax.random.normal(kx, (B, I, N), jnp.float32)

    ref = jnp.einsum("coi,bin->bcon", weight, x)
    ref_b = ref + bias[None, :, :, None]

    # f32 compute path (tight check of the kernel structure).
    out_f32 = jax.block_until_ready(shared_dot(x, weight, bias, compute_dtype=None))
    assert out_f32.shape == (B, C, O, N)
    assert jnp.allclose(out_f32, ref_b, atol=1e-4, rtol=1e-4)

    # Default bf16 MXU path (loose tolerance for bf16 operand rounding).
    out_bf16 = jax.block_until_ready(shared_dot(x, weight, bias))
    assert jnp.allclose(out_bf16, ref_b, atol=5e-2, rtol=5e-2)

    # No-bias path (module default is bias=False).
    out_nb = jax.block_until_ready(shared_dot(x, weight, None))
    assert jnp.allclose(out_nb, ref, atol=5e-2, rtol=5e-2)

    # n_channels == 1 -> output squeezed to (B, O, N), like torch squeeze_(1).
    out_c1 = jax.block_until_ready(shared_dot(x, weight[:1], None))
    assert out_c1.shape == (B, O, N)
    assert jnp.allclose(out_c1, ref[:, 0], atol=5e-2, rtol=5e-2)

    print("KERNEL_OK")
</pallas_src>

<mosaic_0001>
module attributes {stable_mosaic.version = 11 : i64} {
  func.func @_shared_dot_small_kernel(%arg0: i32, %arg1: i32, %arg2: memref<1x32x256xf32, #tpu.memory_space<vmem>>, %arg3: memref<64x32xf32, #tpu.memory_space<vmem>>, %arg4: memref<64x1xf32, #tpu.memory_space<vmem>>, %arg5: memref<1x64x256xf32, #tpu.memory_space<vmem>>) attributes {dimension_semantics = [#tpu.dimension_semantics<parallel>, #tpu.dimension_semantics<parallel>], iteration_bounds = array<i64: 2, 1>, scalar_prefetch = 0 : i64, scratch_operands = 0 : i64, tpu.core_type = #tpu.core_type<tc>, window_params = [{transform_indices = @transform_0, window_bounds = array<i64: 1, 32, 256>}, {pipeline_mode = #tpu.pipeline_mode<synchronous>, transform_indices = @transform_1, window_bounds = array<i64: 64, 32>}, {pipeline_mode = #tpu.pipeline_mode<synchronous>, transform_indices = @transform_2, window_bounds = array<i64: 64, 1>}, {transform_indices = @transform_3, window_bounds = array<i64: 1, 64, 256>}]} {
    %c0 = arith.constant 0 : index
    %c0_0 = arith.constant 0 : index
    %c0_1 = arith.constant 0 : index
    %0 = vector.load %arg2[%c0, %c0_0, %c0_1] : memref<1x32x256xf32, #tpu.memory_space<vmem>>, vector<1x32x256xf32>
    %1 = vector.shape_cast %0 : vector<1x32x256xf32> to vector<32x256xf32>
    %c0_2 = arith.constant 0 : index
    %c0_3 = arith.constant 0 : index
    %2 = vector.load %arg3[%c0_2, %c0_3] : memref<64x32xf32, #tpu.memory_space<vmem>>, vector<64x32xf32>
    %cst = arith.constant dense<0.000000e+00> : vector<64x256xf32>
    %3 = tpu.matmul %2, %1, %cst {dimension_numbers = #tpu.dot_dimension_numbers<[1], [0], [0], [1], [0, 0, 1, 1], [], []>} : vector<64x32xf32>, vector<32x256xf32>, vector<64x256xf32> -> vector<64x256xf32>
    %c0_4 = arith.constant 0 : index
    %c0_5 = arith.constant 0 : index
    %4 = vector.load %arg4[%c0_4, %c0_5] : memref<64x1xf32, #tpu.memory_space<vmem>>, vector<64x1xf32>
    %5 = vector.broadcast %4 : vector<64x1xf32> to vector<64x256xf32>
    %6 = arith.addf %3, %5 : vector<64x256xf32>
    %c0_6 = arith.constant 0 : index
    %c0_7 = arith.constant 0 : index
    %c0_8 = arith.constant 0 : index
    %7 = vector.load %arg5[%c0_6, %c0_7, %c0_8] : memref<1x64x256xf32, #tpu.memory_space<vmem>>, vector<1x64x256xf32>
    %8 = vector.shape_cast %7 : vector<1x64x256xf32> to vector<64x256xf32>
    %9 = vector.shape_cast %6 : vector<64x256xf32> to vector<1x64x256xf32>
    tpu.vector_store %arg5[%c0_6, %c0_7, %c0_8], %9 {strides = array<i32>} : memref<1x64x256xf32, #tpu.memory_space<vmem>>, vector<1x64x256xf32>,
    return
  }
  func.func @transform_0(%arg0: i32, %arg1: i32) -> (i32, i32, i32) {
    %c0_i32 = arith.constant 0 : i32
    %c0_i32_0 = arith.constant 0 : i32
    return %arg0, %c0_i32, %arg1 : i32, i32, i32
  }
  func.func @transform_1(%arg0: i32, %arg1: i32) -> (i32, i32) {
    %c0_i32 = arith.constant 0 : i32
    %c0_i32_0 = arith.constant 0 : i32
    %c0_i32_1 = arith.constant 0 : i32
    return %c0_i32, %c0_i32_0 : i32, i32
  }
  func.func @transform_2(%arg0: i32, %arg1: i32) -> (i32, i32) {
    %c0_i32 = arith.constant 0 : i32
    %c0_i32_0 = arith.constant 0 : i32
    %c0_i32_1 = arith.constant 0 : i32
    return %c0_i32, %c0_i32_0 : i32, i32
  }
  func.func @transform_3(%arg0: i32, %arg1: i32) -> (i32, i32, i32) {
    %c0_i32 = arith.constant 0 : i32
    %c0_i32_0 = arith.constant 0 : i32
    return %arg0, %c0_i32, %arg1 : i32, i32, i32
  }
}

</mosaic_0001>

<bundles_post_ra>
// kernel: tpu_custom_call.1
= control target key start
LH: loop header
LB: loop body
LE: loop exit
PB: predicated region body
PF: predicated region fallthrough
CT: control target
= control target key end

     0   :  { %8 = vsyncpa [#allocation3], 0  ;;  %s908_s0 = inlined_call_operand.vmem [shape: f32[2,32,256], index: 0, kind: input, shape index: {}]   ;;  %s909_s1 = inlined_call_operand.vmem [shape: f32[64,32], index: 1, kind: input, shape index: {}]   ;;  %s910_s2 = inlined_call_operand.vmem [shape: f32[64,1], index: 2, kind: input, shape index: {}]   ;;  %s911_s3 = inlined_call_operand.hbm [shape: f32[2,64,256], index: 3, kind: output, shape index: {}]  }
   0x1   :  { %10 = vsyncpa [#allocation3 + $0x1], 0  ;;  %s714_s12 = smov 0   ;;  %s716_s13 = smov 0  }
   0x2   :  { %s718_s14 = smov 0   ;;  %s720_s15 = smov 0  }
   0x3   :  { %s722_s16 = smov 0   ;;  %s724_s17 = smov 0  }
   0x4 LB: > { %s513_s18 = sadd.s32 4294967295, %s687_s17   ;;  %s514_s19 = sadd.s32 4294967294, %s687_s17   ;;  %s687_s17 = sphi %s724_s17, %s16_s17   ;;  %s683_s16 = sphi %s722_s16, %s918_s16   ;;  %s679_s15 = sphi %s720_s15, %s917_s15   ;;  %s675_s14 = sphi %s718_s14, %s916_s14   ;;  %s671_s13 = sphi %s716_s13, %s915_s13   ;;  %s667_s12 = sphi %s714_s12, %s914_s12  }
   0x5   : > { %s28_s20 = sadd.s32 1, %s683_s16  ;;  %s107_s21 = sadd.s32 1, %s675_s14 }
   0x6   : > { %p30_p0 = scmp.ge.s32.totalorder %s28_s20, 2  ;;  %p117_p1 = scmp.ne.s32.totalorder %s675_s14, %s671_s13 }
   0x7   : > { %p118_p2 = scmp.eq.s32.totalorder %s513_s18, 1  ;;  %p123_p3 = scmp.ne.s32.totalorder %s671_s13, %s667_s12 }
   0x8   : > { %s920_s20 = smov (%p30_p0, %s28_s20), 0  ;;  %p124_p5 = scmp.eq.s32.totalorder %s514_s19, 1 }
   0x9   : > { %p754_p4 = por %p118_p2, %p117_p1  ;;  %s102_s23 = ssub.s32 %s683_s16, %s920_s20 }
   0xa   : > { %p517_p6 = scmp.ge.s32.totalorder %s687_s17, 1  ;;  %p105_p7 = scmp.eq.s32.totalorder %s102_s23, 0 }
   0xb   : > { %p761_p8 = por %p124_p5, %p123_p3  ;;  %p161_p9 = scmp.lt.s32.totalorder %s687_s17, 3 }
   0xc   : > { %s767_s25 = scalar_select %p105_p7, %s675_s14, %s107_s21  }
   0xd   : > { %p162_p10 = pnand %p517_p6, %p161_p9 }
   0xe   : > { %p190_p11 = scmp.lt.s32.totalorder (!%p162_p10), %s679_s15, 1  ;;  %v689_v0 = vmov (!%p162_p10), 0.0   ;;  %v690_v1 = vmov (!%p162_p10), 0   ;;  %v218_v2 = vld [vmem:[%s910_s2 + $0x10] sm:$0xff] (!%p162_p10)  ;;  %v216_v3 = vld [vmem:[%s910_s2] sm:$0xff] (!%p162_p10)  ;;  %v219_v4 = vld [vmem:[%s910_s2 + $0x18] sm:$0xff] (!%p162_p10) }
   0xf   : > { %165 = sbr.rel (%p162_p10) target bundleno = 279 (0x117), region = 32  ;;  %353 = vmatprep.mubr.f32.mxu0 (!%p162_p10), %v689_v0  ;;  %377 = vmatprep.mubr.f32.mxu1 (!%p162_p10), %v689_v0  ;;  %v217_v5 = vld [vmem:[%s910_s2 + $0x8] sm:$0xff] (!%p162_p10)  ;;  %v220_v18 = vld [vmem:[%s910_s2 + $0x20] sm:$0xff] (!%p162_p10)  ;;  %v223_v20 = vld [vmem:[%s910_s2 + $0x38] sm:$0xff] (!%p162_p10)  ;;  %vm264_vm0 = vcmask (!%p162_p10), 261120   ;;  %s186_s29 = sand.u32 (!%p162_p10), 1, %s671_s13  }
  0x10   : > { %608 = vset.pattern.permute.xlu1 (!%p162_p10), %v690_v1  ;;  %607 = vset.pattern.permute.xlu0 (!%p162_p10), %v690_v1  ;;  %v221_v17 = vld [vmem:[%s910_s2 + $0x28] sm:$0xff] (!%p162_p10)  ;;  %v222_v21 = vld [vmem:[%s910_s2 + $0x30] sm:$0xff] (!%p162_p10)  ;;  %v208_v22 = vld [vmem:[%s909_s1] sm:$0xff] (!%p162_p10)  ;;  %s518_s30 = sshll.u32 (!%p162_p10), %s186_s29, 7  ;;  %s535_s5 = sshll.u32 (!%p162_p10), %s679_s15, 11 }
  0x11   : > { %236 = vperm.xlu1 (!%p162_p10), %608, %v218_v2   ;;  %226 = vperm.xlu0 (!%p162_p10), %607, %v216_v3   ;;  %v212_v23 = vld [vmem:[%s909_s1 + $0x20] sm:$0xff] (!%p162_p10)  ;;  %v209_v24 = vld [vmem:[%s909_s1 + $0x8] sm:$0xff] (!%p162_p10)  ;;  %v210_v26 = vld [vmem:[%s909_s1 + $0x10] sm:$0xff] (!%p162_p10)  ;;  %s852_s8 = scalar_lea.hbm (!%p162_p10), %s911_s3, %s535_s5  ;;  %s691_s11 = smov (!%p162_p10), [#allocation2]  }
  0x12   : > { %v213_v25 = vld [vmem:[%s909_s1 + $0x28] sm:$0xff] (!%p162_p10)  ;;  %v214_v27 = vld [vmem:[%s909_s1 + $0x30] sm:$0xff] (!%p162_p10)  ;;  %v211_v28 = vld [vmem:[%s909_s1 + $0x18] sm:$0xff] (!%p162_p10)  ;;  %s613_s18 = sshll.u32 (!%p162_p10), %s691_s11, 4  ;;  %s614_s18 = int_to_ptr.vmem [resolvable:$false] %s613_s18 }
  0x13   : > { %v215_v29 = vld [vmem:[%s909_s1 + $0x38] sm:$0xff] (!%p162_p10)  ;;  %s615_s19 = scalar_lea.vmem (!%p162_p10), %s614_s18, 4096 }
  0x15   : > { %241 = vperm.xlu1 (!%p162_p10), %608, %v219_v4   ;;  %231 = vperm.xlu0 (!%p162_p10), %607, %v217_v5  }
  0x16   : > { %s191_s26 = scalar_select %p190_p11, %s679_s15, 1 }
  0x18   : > { %s534_s4 = sshll.u32 %s191_s26, 6 }
  0x19   : > { %s197_s9 = scalar_lea.vmem %s908_s0, %s534_s4  ;;  %251 = vperm.xlu1 %608, %v221_v17   ;;  %246 = vperm.xlu0 %607, %v220_v18   ;;  %s833_s4 = scalar_lea.vmem [#allocation2], %s518_s30 }
  0x1a   : > { %v201_v6 = vld [vmem:[%s197_s9 + $0x8] sm:$0xff]  ;;  %v203_v7 = vld [vmem:[%s197_s9 + $0x18] sm:$0xff]  ;;  %v200_v8 = vld [vmem:[%s197_s9] sm:$0xff]  ;;  %s434_s6 = sshll.u32 %s833_s4, 4  ;;  %s854_s6 = int_to_ptr.vmem [resolvable:$true] %s434_s6 }
  0x1b   : > { %v536_v9 = vpack.c.bf16 %v203_v7, %v201_v6  ;;  %v202_v10 = vld [vmem:[%s197_s9 + $0x10] sm:$0xff]  ;;  %v205_v11 = vld [vmem:[%s197_s9 + $0x28] sm:$0xff]  ;;  %v207_v12 = vld [vmem:[%s197_s9 + $0x38] sm:$0xff]  ;;  %s609_s10 = scalar_lea.vmem %s854_s6, 2048  ;;  %p616_p1 = scmp.lt.s32.totalorder %s854_s6, %s614_s18 }
  0x1c   : > { %v538_v13 = vpack.c.bf16 %v202_v10, %v200_v8  ;;  %v540_v14 = vpack.c.bf16 %v207_v12, %v205_v11  ;;  %v204_v15 = vld [vmem:[%s197_s9 + $0x20] sm:$0xff]  ;;  %v206_v16 = vld [vmem:[%s197_s9 + $0x30] sm:$0xff]  ;;  %s862_s9 = scalar_lea.sflag [#allocation3], %s186_s29  ;;  %p610_p12 = scmp.ne.s32.totalorder %s854_s6, %s609_s10 }
  0x1d   : > { %537 = vmatprep.subr.bf16.mxu0 %v536_v9  ;;  %544 = vmatprep.subr.bf16.mxu1 %v536_v9  ;;  %v542_v19 = vpack.c.bf16 %v206_v16, %v204_v15  ;;  %p617_p2 = scmp.lt.s32.totalorder %s615_s19, %s609_s10 }
  0x1e   : > { %539 = vmatpush1.bf16.msra.mxu0 %v538_v13  ;;  %546 = vmatpush1.bf16.msra.mxu1 %v538_v13  ;;  %p611_p13 = pnand %p610_p12, %p754_p4 }
  0x1f   : > { %541 = vmatprep.subr.bf16.mxu0 %v540_v14  ;;  %545 = vmatprep.subr.bf16.mxu1 %v540_v14  ;;  %p618_p3 = por %p617_p2, %p616_p1 }
  0x20   : > { %261 = vperm.xlu1 %608, %v223_v20   ;;  %256 = vperm.xlu0 %607, %v222_v21   ;;  %p612_p0 = pneg %p611_p13 }
  0x22   : > { %543 = vmatpush1.bf16.msra.mxu0 %v542_v19  ;;  %547 = vmatpush1.bf16.msra.mxu1 %v542_v19  ;;  %p619_p5 = pnand %p618_p3, %p612_p0 }
  0x25   : > { %521 = vmatmul.mubr.msk.f32.vlgmr.msra.gmra.mrb[0].mxu0 %vm264_vm0, %v208_v22  ;;  %525 = vmatmul.mubr.msk.f32.vlgmr.msra.gmra.mrb[0].mxu1 %vm264_vm0, %v212_v23 }
  0x26   : > { %359 = vmatprep.mubr.f32.mxu0 %v689_v0  ;;  %383 = vmatprep.mubr.f32.mxu1 %v689_v0 }
  0x29   : > { %522 = vmatmul.mubr.msk.f32.gmra.mrb[2].mxu0 %vm264_vm0, %v209_v24  ;;  %526 = vmatmul.mubr.msk.f32.gmra.mrb[2].mxu1 %vm264_vm0, %v213_v25 }
  0x2a   : > { %365 = vmatprep.mubr.f32.mxu0 %v689_v0  ;;  %389 = vmatprep.mubr.f32.mxu1 %v689_v0 }
  0x2d   : > { %523 = vmatmul.mubr.msk.f32.gmra.mrb[4].mxu0 %vm264_vm0, %v210_v26  ;;  %527 = vmatmul.mubr.msk.f32.gmra.mrb[4].mxu1 %vm264_vm0, %v214_v27 }
  0x2e   : > { %371 = vmatprep.mubr.f32.mxu0 %v689_v0  ;;  %395 = vmatprep.mubr.f32.mxu1 %v689_v0 }
  0x31   : > { %524 = vmatmul.mubr.msk.f32.gmra.mrb[6].mxu0 %vm264_vm0, %v211_v28  ;;  %528 = vmatmul.mubr.msk.f32.gmra.mrb[6].mxu1 %vm264_vm0, %v215_v29 }
  0x90   : > { %v227_v30 = vpop.permute.xlu0 %226  ;;  %v237_v31 = vpop.permute.xlu1 %236 }
  0x94   : > { %v232_v32 = vpop.permute.xlu0 %231  ;;  %v242_v33 = vpop.permute.xlu1 %241 }
  0x98   : > { %v247_v34 = vpop.permute.xlu0 %246  ;;  %v252_v43 = vpop.permute.xlu1 %251 }
  0x9f   : > { %v257_v52 = vpop.permute.xlu0 %256  ;;  %v262_v61 = vpop.permute.xlu1 %261 }
  0xf8   : > { %v355_v35 = vpop.f32.mrb[0].mxu0  ;;  %v379_v36 = vpop.f32.mrb[0].mxu1 }
  0xf9   : > { %v356_v37 = vadd.f32 %v355_v35, %v227_v30  ;;  %v380_v38 = vadd.f32 %v379_v36, %v247_v34  ;;  %v357_v39 = vpop.f32.mrb[1].mxu0  ;;  %v381_v40 = vpop.f32.mrb[1].mxu1 }
  0xfa   : > { %v358_v41 = vadd.f32 %v357_v39, %v227_v30  ;;  %v382_v42 = vadd.f32 %v381_v40, %v247_v34 }
  0xfb   : > { %402 = vst [vmem:[%s833_s4] sm:$0xff] %v356_v37  ;;  %410 = vst [vmem:[%s833_s4 + $0x40] sm:$0xff] %v380_v38 }
  0xfc   : > { %403 = vst [vmem:[%s833_s4 + $0x8] sm:$0xff] %v358_v41  ;;  %411 = vst [vmem:[%s833_s4 + $0x48] sm:$0xff] %v382_v42  ;;  %v361_v44 = vpop.f32.mrb[2].mxu0  ;;  %v385_v45 = vpop.f32.mrb[2].mxu1 }
  0xfd   : > { %v362_v46 = vadd.f32 %v361_v44, %v232_v32  ;;  %v386_v47 = vadd.f32 %v385_v45, %v252_v43  ;;  %v363_v48 = vpop.f32.mrb[3].mxu0  ;;  %v387_v49 = vpop.f32.mrb[3].mxu1 }
  0xfe   : > { %v364_v50 = vadd.f32 %v363_v48, %v232_v32  ;;  %v388_v51 = vadd.f32 %v387_v49, %v252_v43 }
  0xff   : > { %404 = vst [vmem:[%s833_s4 + $0x10] sm:$0xff] %v362_v46  ;;  %412 = vst [vmem:[%s833_s4 + $0x50] sm:$0xff] %v386_v47 }
 0x100   : > { %405 = vst [vmem:[%s833_s4 + $0x18] sm:$0xff] %v364_v50  ;;  %413 = vst [vmem:[%s833_s4 + $0x58] sm:$0xff] %v388_v51  ;;  %v367_v53 = vpop.f32.mrb[4].mxu0  ;;  %v391_v54 = vpop.f32.mrb[4].mxu1 }
 0x101   : > { %v368_v55 = vadd.f32 %v367_v53, %v237_v31  ;;  %v392_v56 = vadd.f32 %v391_v54, %v257_v52  ;;  %v369_v57 = vpop.f32.mrb[5].mxu0  ;;  %v393_v58 = vpop.f32.mrb[5].mxu1 }
 0x102   : > { %v370_v59 = vadd.f32 %v369_v57, %v237_v31  ;;  %v394_v60 = vadd.f32 %v393_v58, %v257_v52 }
 0x103   : > { %406 = vst [vmem:[%s833_s4 + $0x20] sm:$0xff] %v368_v55  ;;  %414 = vst [vmem:[%s833_s4 + $0x60] sm:$0xff] %v392_v56 }
 0x104   : > { %407 = vst [vmem:[%s833_s4 + $0x28] sm:$0xff] %v370_v59  ;;  %415 = vst [vmem:[%s833_s4 + $0x68] sm:$0xff] %v394_v60  ;;  %v373_v62 = vpop.f32.mrb[6].mxu0  ;;  %v397_v63 = vpop.f32.mrb[6].mxu1 }
 0x105   : > { %v374_v0 = vadd.f32 %v373_v62, %v242_v33  ;;  %v398_v1 = vadd.f32 %v397_v63, %v262_v61  ;;  %v375_v2 = vpop.f32.mrb[7].mxu0  ;;  %v399_v3 = vpop.f32.mrb[7].mxu1 }
 0x106   : > { %v376_v4 = vadd.f32 %v375_v2, %v242_v33  ;;  %v400_v5 = vadd.f32 %v399_v3, %v262_v61 }
 0x107   : > { %408 = vst [vmem:[%s833_s4 + $0x30] sm:$0xff] %v374_v0  ;;  %416 = vst [vmem:[%s833_s4 + $0x70] sm:$0xff] %v398_v1 }
 0x108   : > { %409 = vst [vmem:[%s833_s4 + $0x38] sm:$0xff] %v376_v4  ;;  %417 = vst [vmem:[%s833_s4 + $0x78] sm:$0xff] %v400_v5 }
 0x109   : > { %622 = shalt.err (!%p619_p5)
}
 0x10a   : > { %s623_s21 = scalar_lea.hbm %s852_s8, 2048  ;;  %s627_s27 = scalar_lea.hbm %s911_s3, 4096 }
 0x10b   : > { %p624_p6 = scmp.ne.s32.totalorder %s852_s8, %s623_s21  ;;  %p628_p10 = scmp.lt.u32.totalorder %s852_s8, %s911_s3 }
 0x10c   : > { %p629_p11 = scmp.lt.u32.totalorder %s627_s27, %s623_s21  ;;  %p631_p13 = scmp.lt.u32.totalorder %s623_s21, %s852_s8 }
 0x10d   : > { %p625_p7 = pnand %p624_p6, %p754_p4 }
 0x10e   : > { %p630_p12 = por %p629_p11, %p628_p10 }
 0x10f   : > { %p626_p9 = pneg %p625_p7 }
 0x110   : > { %p632_p0 = por %p631_p13, %p630_p12 }
 0x112   : > { %p633_p1 = pnand %p632_p0, %p626_p9 }
 0x114   : > { %636 = shalt.err (!%p633_p1)
}
 0x115   : > { %s692_s30 = smov 256   ;;  %s693_s4 = smov 16  }
 0x116   : > { %548 = dma.vmem_to_hbm [thread:$0]  (%p754_p4), %s854_s6, 2048, %s852_s8, %s862_s9, %s692_s30, %s692_s30, %s693_s4  }
 0x117 PF: > { %p554_p2 = scmp.ge.s32.totalorder %s687_s17, 2  ;;  %s449_s5 = sand.u32 1, %s667_s12  }
 0x118   : > { %s450_s7 = scalar_lea.sflag [#allocation3], %s449_s5 }
 0x119   : > { %p551_p3 = pnand %p554_p2, %p761_p8 }
 0x11b   : > { %662 = dma.done.wait (!%p551_p3), %s450_s7, 2048  }
 0x11c   : > { %664 = vsyncadd (!%p551_p3), %s450_s7, 4294965248  ;;  %s16_s17 = sadd.s32 1, %s687_s17   ;;  %s914_s12 = smov %s671_s13 }
 0x11d   : > { %p13_p5 = scmp.ge.s32.totalorder %s16_s17, 4   ;;  %s915_s13 = smov %s675_s14 }
 0x11e   : > { %s916_s14 = smov %s767_s25  ;;  %s917_s15 = smov %s683_s16 }
 0x11f   : > { %s918_s16 = smov %s920_s20  ;;  %15 = sbr.rel (!%p13_p5) target bundleno = 4 (0x4), region = 67 }
 0x126   :  { %455 = vsyncpa [#allocation3], 1 }
 0x127   :  { %457 = vsyncpa [#allocation3 + $0x1], 1 }

</bundles_post_ra>
